<compile_context>
chip_gen: v7x
topology: tpu7x:2x2x1
jax: 0.10.0
libtpu: 0.0.40
codegen_flags: <defaults>
</compile_context>

<pallas_src>
import math

import jax
import jax.numpy as jnp
from jax.experimental import pallas as pl
from jax.experimental.pallas import tpu as pltpu


def _round_up(x: int, m: int) -> int:
    return ((x + m - 1) // m) * m


def _vmem_limit_bytes() -> int:
    """Budget ~7/8 of physical VMEM (leaves headroom for internal scratch/semaphores)."""
    try:
        cap = pltpu.get_tpu_info().vmem_capacity_bytes
    except Exception:
        cap = 64 * 1024 * 1024  # conservative fallback: v7x physical VMEM per TC
    return int(cap * 7 // 8)


# --------------------------------------------------------------------------------------
# Fused MLP kernel with H tiling:
#   per (row_tile i, hidden_tile h):  acc += relu(x_i @ W1t[:, h]) @ W2t[h, :]
#   store acc -> o on the last hidden tile.
# --------------------------------------------------------------------------------------
def _mlp_kernel(x_ref, w1t_ref, w2t_ref, o_ref, acc_ref):
    h_idx = pl.program_id(1)

    @pl.when(h_idx == 0)
    def _():
        acc_ref[...] = jnp.zeros_like(acc_ref)

    x = x_ref[...]
    if x.dtype != jnp.bfloat16:            # trace-time check: only cast genuinely-f32 input
        x = x.astype(jnp.bfloat16)

    # Partial first projection over this hidden chunk, f32 accumulation on the MXU.
    h = jnp.dot(x, w1t_ref[...], preferred_element_type=jnp.float32)
    h = jnp.maximum(h, 0.0)                # ReLU in f32 (portable to v5e's f32-only VPU)

    # Accumulate the second projection into the f32 scratch.
    acc_ref[...] += jnp.dot(h.astype(jnp.bfloat16), w2t_ref[...],
                            preferred_element_type=jnp.float32)

    @pl.when(h_idx == pl.num_programs(1) - 1)
    def _():
        o_ref[...] = acc_ref[...].astype(o_ref.dtype)


# --------------------------------------------------------------------------------------
# One-time weight preparation (do NOT call per forward):
#   PyTorch layout (out_features, in_features) f32  ->  padded (in, out) bf16.
# --------------------------------------------------------------------------------------
def prepare_mlp_weights(w1, w2):
    H, D = w1.shape
    assert w2.shape == (D, H)
    D_p = _round_up(D, 128)
    H_p = _round_up(H, 128)
    w1t = jnp.pad(w1.T.astype(jnp.bfloat16), ((0, D_p - D), (0, H_p - H)))  # (D_p, H_p)
    w2t = jnp.pad(w2.T.astype(jnp.bfloat16), ((0, H_p - H), (0, D_p - D)))  # (H_p, D_p)
    return w1t, w2t


def mlp(x, w1t, w2t, *, block_rows: int = 512, block_hidden: int = 512):
    """x: (B, S, D).  w1t: (D_p, H_p) bf16, w2t: (H_p, D_p) bf16 from prepare_mlp_weights."""
    B, S, D = x.shape
    D_p, H_p = w1t.shape
    assert w2t.shape == (H_p, D_p)
    assert D <= D_p

    rows = B * S
    x2 = x.reshape(rows, D)
    if D != D_p:
        # Small-shape fallback only: real model dims are already multiples of 128 lanes,
        # in which case this branch is never taken and there is no per-call pad pass.
        x2 = jnp.pad(x2, ((0, 0), (0, D_p - D)))

    # Row tile: multiple of 8 sublanes; ragged last tile handled by Pallas block padding
    # (rows are independent, so garbage in OOB rows never reaches a committed store).
    tm = min(block_rows, _round_up(rows, 8))
    if rows > 8 and pl.cdiv(rows, tm) < 2:
        tm = _round_up(pl.cdiv(rows, 2), 8)    # give both TensorCores work on v7x
    n_row = pl.cdiv(rows, tm)

    # Hidden tile: multiple of 128 that divides H_p (weights were zero-padded to 128).
    th = max(128, (min(block_hidden, H_p) // 128) * 128)
    while H_p % th:
        th -= 128
    n_h = H_p // th

    out = pl.pallas_call(
        _mlp_kernel,
        out_shape=jax.ShapeDtypeStruct((rows, D_p), x.dtype),
        grid=(n_row, n_h),
        in_specs=[
            pl.BlockSpec((tm, D_p), lambda i, h: (i, 0)),   # x tile: resident across h
            pl.BlockSpec((D_p, th), lambda i, h: (0, h)),   # W1^T hidden chunk
            pl.BlockSpec((th, D_p), lambda i, h: (h, 0)),   # W2^T hidden chunk
        ],
        out_specs=pl.BlockSpec((tm, D_p), lambda i, h: (i, 0)),
        scratch_shapes=[pltpu.VMEM((tm, D_p), jnp.float32)],  # f32 accumulator
        compiler_params=pltpu.CompilerParams(
            dimension_semantics=("parallel", "arbitrary"),
            vmem_limit_bytes=_vmem_limit_bytes(),
        ),
    )(x2, w1t, w2t)

    if D != D_p:
        out = out[:, :D]
    return out.reshape(B, S, D)


# --------------------------------------------------------------------------------------
# Parameter init (PyTorch nn.Linear default: uniform(-1/sqrt(fan_in), 1/sqrt(fan_in)))
# --------------------------------------------------------------------------------------
def _linear_init(key, out_f, in_f):
    bound = 1.0 / math.sqrt(in_f)
    return jax.random.uniform(key, (out_f, in_f), jnp.float32, minval=-bound, maxval=bound)


def init_mlp_params(key, dim, hidden_dim):
    k1, k2 = jax.random.split(key)
    return {
        "w1": _linear_init(k1, hidden_dim, dim),   # (H, D)
        "w2": _linear_init(k2, dim, hidden_dim),   # (D, H)
    }


# --------------------------------------------------------------------------------------
# Pure-JAX f32 reference (loose check against the bf16-in / f32-accumulate kernel path)
# --------------------------------------------------------------------------------------
def mlp_ref(x, w1, w2):
    h = jnp.maximum(jnp.einsum("bsd,hd->bsh", x, w1), 0.0)
    return jnp.einsum("bsh,dh->bsd", h, w2)


if __name__ == "__main__":
    # Small shapes consistent with the module: batch=2, seq=8, dim=32, hidden_dim=64.
    B, S, D, H = 2, 8, 32, 64

    key = jax.random.PRNGKey(0)
    kx, kp = jax.random.split(key)
    x = jax.random.normal(kx, (B, S, D), jnp.float32)
    params = init_mlp_params(kp, D, H)

    # One-time layout conversion (not part of the per-forward cost).
    w1t, w2t = prepare_mlp_weights(params["w1"], params["w2"])

    out = mlp(x, w1t, w2t)
    out = jax.block_until_ready(out)

    assert out.shape == (B, S, D), out.shape
    assert bool(jnp.all(jnp.isfinite(out)))

    # Loose tolerance: kernel uses bf16 matmul inputs with f32 accumulation.
    ref = mlp_ref(x, params["w1"], params["w2"])
    max_err = float(jnp.max(jnp.abs(out - ref)))
    assert max_err < 0.1, f"max abs error {max_err}"

    print("KERNEL_OK")
</pallas_src>

<mosaic_0001>
module attributes {stable_mosaic.version = 11 : i64} {
  func.func @_mlp_kernel(%arg0: i32, %arg1: i32, %arg2: memref<8x128xf32, #tpu.memory_space<vmem>>, %arg3: memref<128x128xbf16, #tpu.memory_space<vmem>>, %arg4: memref<128x128xbf16, #tpu.memory_space<vmem>>, %arg5: memref<8x128xf32, #tpu.memory_space<vmem>>, %arg6: memref<8x128xf32, #tpu.memory_space<vmem>>) attributes {dimension_semantics = [#tpu.dimension_semantics<parallel>, #tpu.dimension_semantics<arbitrary>], iteration_bounds = array<i64: 2, 1>, scalar_prefetch = 0 : i64, scratch_operands = 1 : i64, tpu.core_type = #tpu.core_type<tc>, window_params = [{transform_indices = @transform_0, window_bounds = array<i64: 8, 128>}, {transform_indices = @transform_1, window_bounds = array<i64: 128, 128>}, {transform_indices = @transform_2, window_bounds = array<i64: 128, 128>}, {transform_indices = @transform_3, window_bounds = array<i64: 8, 128>}]} {
    %c0_i32 = arith.constant 0 : i32
    %0 = arith.cmpi eq, %arg1, %c0_i32 : i32
    %1 = arith.extui %0 : i1 to i32
    %c0_i32_0 = arith.constant 0 : i32
    %2 = arith.cmpi ne, %1, %c0_i32_0 : i32
    scf.if %2 {
      %cst_14 = arith.constant 0.000000e+00 : f32
      %18 = vector.broadcast %cst_14 : f32 to vector<8x128xf32>
      %c0_15 = arith.constant 0 : index
      %c0_16 = arith.constant 0 : index
      %19 = vector.load %arg6[%c0_15, %c0_16] : memref<8x128xf32, #tpu.memory_space<vmem>>, vector<8x128xf32>
      tpu.vector_store %arg6[%c0_15, %c0_16], %18 {strides = array<i32>} : memref<8x128xf32, #tpu.memory_space<vmem>>, vector<8x128xf32>,
    } else {
    }
    %c0 = arith.constant 0 : index
    %c0_1 = arith.constant 0 : index
    %3 = vector.load %arg2[%c0, %c0_1] : memref<8x128xf32, #tpu.memory_space<vmem>>, vector<8x128xf32>
    %4 = arith.truncf %3 : vector<8x128xf32> to vector<8x128xbf16>
    %c0_2 = arith.constant 0 : index
    %c0_3 = arith.constant 0 : index
    %5 = vector.load %arg3[%c0_2, %c0_3] : memref<128x128xbf16, #tpu.memory_space<vmem>>, vector<128x128xbf16>
    %cst = arith.constant dense<0.000000e+00> : vector<8x128xf32>
    %6 = tpu.matmul %4, %5, %cst {dimension_numbers = #tpu.dot_dimension_numbers<[1], [0], [0], [1], [0, 0, 1, 1], [], []>} : vector<8x128xbf16>, vector<128x128xbf16>, vector<8x128xf32> -> vector<8x128xf32>
    %cst_4 = arith.constant 0.000000e+00 : f32
    %7 = vector.broadcast %cst_4 : f32 to vector<8x128xf32>
    %8 = arith.maximumf %6, %7 : vector<8x128xf32>
    %c0_5 = arith.constant 0 : index
    %c0_6 = arith.constant 0 : index
    %9 = vector.load %arg6[%c0_5, %c0_6] : memref<8x128xf32, #tpu.memory_space<vmem>>, vector<8x128xf32>
    %10 = arith.truncf %8 : vector<8x128xf32> to vector<8x128xbf16>
    %c0_7 = arith.constant 0 : index
    %c0_8 = arith.constant 0 : index
    %11 = vector.load %arg4[%c0_7, %c0_8] : memref<128x128xbf16, #tpu.memory_space<vmem>>, vector<128x128xbf16>
    %cst_9 = arith.constant dense<0.000000e+00> : vector<8x128xf32>
    %12 = tpu.matmul %10, %11, %cst_9 {dimension_numbers = #tpu.dot_dimension_numbers<[1], [0], [0], [1], [0, 0, 1, 1], [], []>} : vector<8x128xbf16>, vector<128x128xbf16>, vector<8x128xf32> -> vector<8x128xf32>
    %13 = arith.addf %9, %12 : vector<8x128xf32>
    %c0_10 = arith.constant 0 : index
    %c0_11 = arith.constant 0 : index
    %14 = vector.load %arg6[%c0_10, %c0_11] : memref<8x128xf32, #tpu.memory_space<vmem>>, vector<8x128xf32>
    tpu.vector_store %arg6[%c0_10, %c0_11], %13 {strides = array<i32>} : memref<8x128xf32, #tpu.memory_space<vmem>>, vector<8x128xf32>,
    %c0_i32_12 = arith.constant 0 : i32
    %15 = arith.cmpi eq, %arg1, %c0_i32_12 : i32
    %16 = arith.extui %15 : i1 to i32
    %c0_i32_13 = arith.constant 0 : i32
    %17 = arith.cmpi ne, %16, %c0_i32_13 : i32
    scf.if %17 {
      %c0_14 = arith.constant 0 : index
      %c0_15 = arith.constant 0 : index
      %18 = vector.load %arg6[%c0_14, %c0_15] : memref<8x128xf32, #tpu.memory_space<vmem>>, vector<8x128xf32>
      %c0_16 = arith.constant 0 : index
      %c0_17 = arith.constant 0 : index
      %19 = vector.load %arg5[%c0_16, %c0_17] : memref<8x128xf32, #tpu.memory_space<vmem>>, vector<8x128xf32>
      tpu.vector_store %arg5[%c0_16, %c0_17], %18 {strides = array<i32>} : memref<8x128xf32, #tpu.memory_space<vmem>>, vector<8x128xf32>,
    } else {
    }
    return
  }
  func.func @transform_0(%arg0: i32, %arg1: i32) -> (i32, i32) {
    %c0_i32 = arith.constant 0 : i32
    %c0_i32_0 = arith.constant 0 : i32
    return %arg0, %c0_i32 : i32, i32
  }
  func.func @transform_1(%arg0: i32, %arg1: i32) -> (i32, i32) {
    %c0_i32 = arith.constant 0 : i32
    %c0_i32_0 = arith.constant 0 : i32
    return %c0_i32, %arg1 : i32, i32
  }
  func.func @transform_2(%arg0: i32, %arg1: i32) -> (i32, i32) {
    %c0_i32 = arith.constant 0 : i32
    %c0_i32_0 = arith.constant 0 : i32
    return %arg1, %c0_i32 : i32, i32
  }
  func.func @transform_3(%arg0: i32, %arg1: i32) -> (i32, i32) {
    %c0_i32 = arith.constant 0 : i32
    %c0_i32_0 = arith.constant 0 : i32
    return %arg0, %c0_i32 : i32, i32
  }
}

</mosaic_0001>

<bundles_post_ra>
// kernel: tpu_custom_call.1
= control target key start
LH: loop header
LB: loop body
LE: loop exit
PB: predicated region body
PF: predicated region fallthrough
CT: control target
= control target key end

     0   :  { %8 = vsyncpa [#allocation4], 0  ;;  %s1237_s0 = inlined_call_operand.hbm [shape: f32[16,128], index: 0, kind: input, shape index: {}]   ;;  %s1238_s1 = inlined_call_operand.hbm [shape: bf16[128,128], index: 1, kind: input, shape index: {}]   ;;  %s1239_s2 = inlined_call_operand.hbm [shape: bf16[128,128], index: 2, kind: input, shape index: {}]   ;;  %s1240_s3 = inlined_call_operand.hbm [shape: f32[16,128], index: 3, kind: output, shape index: {}]  }
   0x1   :  { %10 = vsyncpa [#allocation4 + $0x1], 0 }
   0x2   :  { %11 = vsyncpa [#allocation7], 0 }
   0x3   :  { %12 = vsyncpa [#allocation5], 0 }
   0x4   :  { %14 = vsyncpa [#allocation5 + $0x1], 0  ;;  %s980_s12 = smov 0   ;;  %s982_s13 = smov 0  }
   0x5   :  { %s984_s14 = smov 0   ;;  %s986_s15 = smov 0  }
   0x6   :  { %s988_s16 = smov 0   ;;  %s990_s17 = smov 0  }
   0x7 LB: > { %s584_s18 = sadd.s32 4294967295, %s950_s17   ;;  %s585_s19 = sadd.s32 4294967294, %s950_s17   ;;  %s950_s17 = sphi %s990_s17, %s20_s17   ;;  %s946_s16 = sphi %s988_s16, %s1262_s16   ;;  %s942_s15 = sphi %s986_s15, %s1261_s15   ;;  %s938_s14 = sphi %s984_s14, %s1260_s14   ;;  %s934_s13 = sphi %s982_s13, %s1259_s13   ;;  %s930_s12 = sphi %s980_s12, %s1258_s12  }
   0x8   : > { %p52_p0 = scmp.ne.s32.totalorder %s934_s13, %s930_s12  ;;  %p1014_p1 = scmp.eq.s32.totalorder %s584_s18, 0 }
   0x9   : > { %p1018_p2 = scmp.eq.s32.totalorder %s584_s18, 1  ;;  %p134_p3 = scmp.eq.s32.totalorder %s585_s19, 1 }
   0xa   : > { %s1245_s20 = scalar_select %p1014_p1, 1, 0 }
   0xb   : > { %p1024_p4 = por %p1014_p1, %p52_p0  ;;  %p586_p5 = scmp.ge.s32.totalorder %s950_s17, 1 }
   0xc   : > { %p1029_p6 = por %p134_p3, %p52_p0  ;;  %p141_p7 = scmp.lt.s32.totalorder %s950_s17, 3 }
   0xd   : > { %s1247_s22 = scalar_select %p1024_p4, 1, 0 }
   0xe   : > { %s1248_s23 = scalar_select %p1029_p6, 1, 0 }
   0xf   : > { %p1034_p8 = pnand %p586_p5, %p141_p7  ;;  %s952_s25 = smov [#allocation6]  }
  0x10   : > { %s155_s26 = sshll.u32 %s952_s25, 4  ;;  %s953_s28 = smov [#allocation8]   ;;  %s1038_s26 = int_to_ptr.vmem [resolvable:$true] %s155_s26 }
  0x11   : > { %p687_p9 = pneg %p1034_p8  ;;  %s171_s29 = sshll.u32 %s953_s28, 4  ;;  %s1049_s29 = int_to_ptr.vmem [resolvable:$true] %s171_s29 }
  0x12   : > { %s778_s5 = scalar_lea.hbm %s1238_s1, 1024 }
  0x13   : > { %p1045_p11 = pnand %p687_p9, %p1014_p1  ;;  %p779_p12 = scmp.ne.s32.totalorder %s1238_s1, %s778_s5 }
  0x14   : > { %p785_p5 = scmp.lt.u32.totalorder %s778_s5, %s1238_s1 }
  0x15   : > { %p780_p13 = pneg %p1045_p11 }
  0x17   : > { %p781_p0 = pnand %p780_p13, %p779_p12 }
  0x19   : > { %p782_p3 = pneg %p781_p0 }
  0x1b   : > { %p787_p7 = pnand %p785_p5, %p782_p3 }
  0x1d   : > { %790 = shalt.err (!%p787_p7)
}
  0x1e   : > { %s791_s10 = scalar_lea.vmem %s1038_s26, 1024  ;;  %p799_p1 = scmp.lt.s32.totalorder %s1038_s26, %s1038_s26 }
  0x1f   : > { %p792_p9 = scmp.ne.s32.totalorder %s1038_s26, %s791_s10  ;;  %p800_p12 = scmp.lt.s32.totalorder %s791_s10, %s791_s10 }
  0x21   : > { %p794_p10 = pnand %p792_p9, %p780_p13  ;;  %p801_p0 = por %p800_p12, %p799_p1 }
  0x23   : > { %p795_p6 = pneg %p794_p10 }
  0x25   : > { %p802_p4 = pnand %p801_p0, %p795_p6 }
  0x27   : > { %805 = shalt.err (!%p802_p4)
}
  0x28   : > { %s954_s11 = smov 64   ;;  %s955_s18 = smov 4  }
  0x29   : > { %690 = dma.hbm_to_vmem [thread:$0]  (!%p1045_p11), %s1238_s1, 1024, %s1038_s26, [#allocation7], %s954_s11, %s954_s11, %s955_s18  }
  0x2a   : > { %s806_s4 = scalar_lea.hbm %s1239_s2, 1024 }
  0x2b   : > { %p807_p1 = scmp.ne.s32.totalorder %s1239_s2, %s806_s4  ;;  %p813_p10 = scmp.lt.u32.totalorder %s806_s4, %s1239_s2 }
  0x2d   : > { %p809_p4 = pnand %p807_p1, %p780_p13 }
  0x2f   : > { %p810_p6 = pneg %p809_p4 }
  0x31   : > { %p815_p3 = pnand %p813_p10, %p810_p6 }
  0x33   : > { %818 = shalt.err (!%p815_p3)
}
  0x34   : > { %s819_s26 = scalar_lea.vmem %s1049_s29, 1024  ;;  %p827_p12 = scmp.lt.s32.totalorder %s1049_s29, %s1049_s29 }
  0x35   : > { %p820_p5 = scmp.ne.s32.totalorder %s1049_s29, %s819_s26  ;;  %p828_p0 = scmp.lt.s32.totalorder %s819_s26, %s819_s26 }
  0x37   : > { %p822_p7 = pnand %p820_p5, %p780_p13  ;;  %p829_p1 = por %p828_p0, %p827_p12 }
  0x39   : > { %p823_p9 = pneg %p822_p7 }
  0x3b   : > { %p830_p4 = pnand %p829_p1, %p823_p9 }
  0x3d   : > { %833 = shalt.err (!%p830_p4)
}
  0x3e   : > { %693 = dma.hbm_to_vmem [thread:$0]  (!%p1045_p11), %s1239_s2, 1024, %s1049_s29, [#allocation7], %s954_s11, %s954_s11, %s955_s18  }
  0x3f   : > { %s32_s19 = sadd.s32 1, %s946_s16  ;;  %s39_s25 = sadd.s32 1, %s938_s14 }
  0x40   : > { %p34_p13 = scmp.ge.s32.totalorder %s32_s19, 2  ;;  %p46_p6 = scmp.ne.s32.totalorder %s938_s14, %s934_s13 }
  0x41   : > { %p47_p10 = scmp.eq.s32.totalorder %s950_s17, 0  ;;  %p704_p3 = scmp.lt.s32.totalorder %s950_s17, 2 }
  0x42   : > { %s1264_s19 = smov (%p34_p13, %s32_s19), 0  ;;  %p1113_p7 = por %p1018_p2, %p46_p6 }
  0x43   : > { %p48_p5 = por %p47_p10, %p46_p6  ;;  %s36_s28 = ssub.s32 %s946_s16, %s1264_s19 }
  0x44   : > { %s1251_s27 = scalar_select %p1113_p7, 1, 0 }
  0x45   : > { %s185_s30 = sand.u32 1, %s938_s14   ;;  %p37_p9 = scmp.eq.s32.totalorder %s36_s28, 0 }
  0x46   : > { %s590_s29 = sshll.u32 %s185_s30, 3  ;;  %s591_s11 = sshll.u32 %s946_s16, 7 }
  0x47   : > { %s1122_s18 = scalar_select %p37_p9, %s938_s14, %s39_s25  }
  0x48   : > { %s1127_s6 = scalar_lea.hbm %s1237_s0, %s591_s11  ;;  %s189_s21 = scalar_lea.vmem [#allocation3], %s590_s29 }
  0x49   : > { %s196_s7 = sshll.u32 %s189_s21, 4  ;;  %p1131_p2 = pnand %p704_p3, %p48_p5  ;;  %s1135_s7 = int_to_ptr.vmem [resolvable:$true] %s196_s7 }
  0x4a   : > { %s186_s26 = scalar_lea.sflag [#allocation4], %s185_s30  ;;  %s834_s9 = scalar_lea.hbm %s1127_s6, 128 }
  0x4b   : > { %p835_p11 = scmp.ne.s32.totalorder %s1127_s6, %s834_s9  ;;  %p836_p12 = pneg %p1131_p2 }
  0x4c   : > { %s839_s28 = scalar_lea.hbm %s1237_s0, 256  ;;  %p840_p4 = scmp.lt.u32.totalorder %s1127_s6, %s1237_s0 }
  0x4d   : > { %p837_p0 = pnand %p836_p12, %p835_p11  ;;  %p841_p13 = scmp.lt.u32.totalorder %s839_s28, %s834_s9 }
  0x4e   : > { %p843_p10 = scmp.lt.u32.totalorder %s834_s9, %s1127_s6 }
  0x4f   : > { %p838_p1 = pneg %p837_p0  ;;  %p842_p6 = por %p841_p13, %p840_p4 }
  0x51   : > { %p844_p3 = por %p843_p10, %p842_p6 }
  0x53   : > { %p845_p5 = pnand %p844_p3, %p838_p1 }
  0x55   : > { %848 = shalt.err (!%p845_p5)
}
  0x56   : > { %s849_s30 = scalar_lea.vmem %s1135_s7, 128  ;;  %s956_s4 = smov [#allocation3]  }
  0x57   : > { %p850_p9 = scmp.ne.s32.totalorder %s1135_s7, %s849_s30  ;;  %s854_s5 = sshll.u32 %s956_s4, 4  ;;  %s855_s5 = int_to_ptr.vmem [resolvable:$false] %s854_s5 }
  0x58   : > { %s856_s21 = scalar_lea.vmem %s855_s5, 256  ;;  %p857_p7 = scmp.lt.s32.totalorder %s1135_s7, %s855_s5 }
  0x59   : > { %p852_p11 = pnand %p850_p9, %p836_p12  ;;  %p858_p4 = scmp.lt.s32.totalorder %s856_s21, %s849_s30 }
  0x5b   : > { %p853_p0 = pneg %p852_p11  ;;  %p859_p13 = por %p858_p4, %p857_p7 }
  0x5d   : > { %p860_p6 = pnand %p859_p13, %p853_p0 }
  0x5f   : > { %863 = shalt.err (!%p860_p6)
}
  0x60   : > { %697 = dma.hbm_to_vmem [thread:$0]  (!%p1131_p2), %s1127_s6, 128, %s1135_s7, %s186_s26  }
  0x61   : > { %205 = sbr.rel (%p1034_p8) target bundleno = 585 (0x249), region = 32  ;;  %s1165_s9 = sand.u32 (!%p1034_p8), 1, %s934_s13  }
  0x62   : > { %s593_s10 = sshll.u32 (!%p1034_p8), %s1165_s9, 3  ;;  %s208_s25 = scalar_lea.sflag (!%p1034_p8), [#allocation4], %s1165_s9 }
  0x63   : > { %s1171_s28 = scalar_lea.vmem (!%p1034_p8), [#allocation3], %s593_s10  ;;  %p1253_p7 = scmp.ne.s32.totalorder (!%p1034_p8), %s1247_s22, 0 }
  0x68   : > { %917 = dma.done.wait (%p1253_p7), %s208_s25, 128  }
  0x69   : > { %919 = vsyncadd (%p1253_p7), %s208_s25, 4294967168  ;;  %p1254_p2 = scmp.ne.s32.totalorder %s1245_s20, 0 }
  0x6b   : > { %921 = dma.done.wait (%p1254_p2), [#allocation7], 2048  }
  0x6c   : > { %923 = vsyncadd (%p1254_p2), [#allocation7], 4294965248  ;;  %v957_v0 = vmov 0.0   ;;  %vm958_vm0 = vmmov 0   ;;  %v762_v1 = vld [vmem:[#allocation6] sm:$0xff]   ;;  %v763_v2 = vld [vmem:[#allocation6 + $0x8] sm:$0xff]  }
  0x6d   : > { %635 = vmatprep.subr.bf16.mxu0 %v957_v0  ;;  %651 = vmatprep.mubr.msk.bf16.mxu0 %vm958_vm0, %v957_v0  ;;  %v764_v3 = vld [vmem:[#allocation6 + $0x10] sm:$0xff]   ;;  %v770_v4 = vld [vmem:[#allocation8] sm:$0xff]   ;;  %v765_v5 = vld [vmem:[#allocation6 + $0x18] sm:$0xff]   ;;  %s241_s20 = scalar_lea.vmem [#allocation9], %s593_s10  ;;  %s614_s24 = sshll.u32 %s942_s15, 7 }
  0x6e   : > { %655 = vmatprep.subr.bf16.mxu1 %v957_v0  ;;  %671 = vmatprep.mubr.msk.bf16.mxu1 %vm958_vm0, %v957_v0  ;;  %v771_v6 = vld [vmem:[#allocation8 + $0x8] sm:$0xff]   ;;  %v766_v7 = vld [vmem:[#allocation6 + $0x20] sm:$0xff]   ;;  %v772_v8 = vld [vmem:[#allocation8 + $0x10] sm:$0xff]   ;;  %s483_s22 = sshll.u32 %s241_s20, 4  ;;  %s1190_s8 = scalar_lea.hbm %s1240_s3, %s614_s24  ;;  %s1185_s22 = int_to_ptr.vmem [resolvable:$true] %s483_s22 }
  0x6f   : > { %636 = vmatpush3.bf16.msra.mxu0 %v762_v1  ;;  %656 = vmatpush3.bf16.msra.mxu1 %v770_v4  ;;  %v767_v9 = vld [vmem:[#allocation6 + $0x28] sm:$0xff]   ;;  %v773_v10 = vld [vmem:[#allocation8 + $0x18] sm:$0xff]   ;;  %v768_v11 = vld [vmem:[#allocation6 + $0x30] sm:$0xff]   ;;  %s470_s26 = scalar_lea.sflag [#allocation5], %s1165_s9  ;;  %s864_s29 = scalar_lea.vmem %s1185_s22, 128 }
  0x70   : > { %637 = vmatprep.subr.bf16.mxu0 %v957_v0  ;;  %657 = vmatprep.subr.bf16.mxu1 %v957_v0  ;;  %v774_v12 = vld [vmem:[#allocation8 + $0x20] sm:$0xff]   ;;  %v769_v13 = vld [vmem:[#allocation6 + $0x38] sm:$0xff]   ;;  %v775_v15 = vld [vmem:[#allocation8 + $0x28] sm:$0xff]   ;;  %p865_p8 = scmp.ne.s32.totalorder %s1185_s22, %s864_s29  ;;  %p1255_p12 = scmp.ne.s32.totalorder %s1251_s27, 0 }
  0x71   : > { %v249_v14 = vld [vmem:[%s1171_s28] sm:$0xff]  ;;  %s959_s15 = smov [#allocation9]  }
  0x72   : > { %v250_v16 = vpack.c.bf16 %v249_v14, %v249_v14  ;;  %v776_v17 = vld [vmem:[#allocation8 + $0x30] sm:$0xff]   ;;  %v777_v18 = vld [vmem:[#allocation8 + $0x38] sm:$0xff]   ;;  %p866_p1 = pnand %p865_p8, %p1255_p12  ;;  %s868_s11 = sshll.u32 %s959_s15, 4  ;;  %s869_s11 = int_to_ptr.vmem [resolvable:$false] %s868_s11 }
  0x73   : > { %638 = vmatpush3.bf16.msra.mxu0 %v763_v2  ;;  %658 = vmatpush3.bf16.msra.mxu1 %v771_v6  ;;  %s870_s30 = scalar_lea.vmem %s869_s11, 256  ;;  %p871_p3 = scmp.lt.s32.totalorder %s1185_s22, %s869_s11 }
  0x74   : > { %639 = vmatprep.subr.bf16.mxu0 %v957_v0  ;;  %659 = vmatprep.subr.bf16.mxu1 %v957_v0  ;;  %p867_p10 = pneg %p866_p1  ;;  %p872_p5 = scmp.lt.s32.totalorder %s870_s30, %s864_s29 }
  0x76   : > { %p873_p9 = por %p872_p5, %p871_p3 }
  0x77   : > { %640 = vmatpush3.bf16.msra.mxu0 %v764_v3  ;;  %660 = vmatpush3.bf16.msra.mxu1 %v772_v8 }
  0x78   : > { %641 = vmatprep.subr.bf16.mxu0 %v957_v0  ;;  %661 = vmatprep.subr.bf16.mxu1 %v957_v0  ;;  %p874_p11 = pnand %p873_p9, %p867_p10 }
  0x7b   : > { %642 = vmatpush3.bf16.msra.mxu0 %v765_v5  ;;  %662 = vmatpush3.bf16.msra.mxu1 %v773_v10 }
  0x7c   : > { %643 = vmatprep.subr.bf16.mxu0 %v957_v0  ;;  %663 = vmatprep.subr.bf16.mxu1 %v957_v0 }
  0x7f   : > { %644 = vmatpush3.bf16.msra.mxu0 %v766_v7  ;;  %664 = vmatpush3.bf16.msra.mxu1 %v774_v12 }
  0x80   : > { %645 = vmatprep.subr.bf16.mxu0 %v957_v0  ;;  %665 = vmatprep.subr.bf16.mxu1 %v957_v0 }
  0x83   : > { %646 = vmatpush3.bf16.msra.mxu0 %v767_v9  ;;  %666 = vmatpush3.bf16.msra.mxu1 %v775_v15 }
  0x84   : > { %647 = vmatprep.subr.bf16.mxu0 %v957_v0  ;;  %667 = vmatprep.subr.bf16.mxu1 %v957_v0 }
  0x87   : > { %648 = vmatpush3.bf16.msra.mxu0 %v768_v11  ;;  %668 = vmatpush3.bf16.msra.mxu1 %v776_v17 }
  0x88   : > { %649 = vmatprep.subr.bf16.mxu0 %v957_v0  ;;  %669 = vmatprep.subr.bf16.mxu1 %v957_v0 }
  0x8b   : > { %650 = vmatpush3.bf16.msra.mxu0 %v769_v13  ;;  %670 = vmatpush3.bf16.msra.mxu1 %v777_v18 }
  0x8e   : > { %652 = vmatmul.mubr.bf16.vlgmr.msra.gmra.mrb[0].mxu0 %v250_v16 }
 0x161   : > { %v349_v19 = vpop.f32.mrb[0].mxu0 }
 0x162   : > { %v355_v20 = vmax.f32 %v349_v19, 0.0  ;;  %v653_v21 = vpop.f32.mrb[1].mxu0 }
 0x163   : > { %v352_v22 = vpop.f32.mrb[2].mxu0 }
 0x164   : > { %v357_v23 = vpack.c.bf16 %v355_v20, %v355_v20  ;;  %v654_v24 = vpop.f32.mrb[3].mxu0 }
 0x166   : > { %672 = vmatmul.mubr.bf16.vlgmr.msra.gmra.mrb[0].mxu1 %v357_v23 }
 0x239   : > { %v456_v25 = vpop.f32.mrb[0].mxu1 }
 0x23a   : > { %468 = vst [vmem:[%s241_s20] sm:$0xff] %v456_v25  ;;  %v673_v26 = vpop.f32.mrb[1].mxu1 }
 0x23b   : > { %v459_v27 = vpop.f32.mrb[2].mxu1 }
 0x23c   : > { %877 = shalt.err (!%p874_p11)
}
 0x23d   : > { %s878_s4 = scalar_lea.hbm %s1190_s8, 128  ;;  %s882_s9 = scalar_lea.hbm %s1240_s3, 256 }
 0x23e   : > { %p879_p0 = scmp.ne.s32.totalorder %s1190_s8, %s878_s4  ;;  %p883_p6 = scmp.lt.u32.totalorder %s1190_s8, %s1240_s3 }
 0x23f   : > { %p884_p7 = scmp.lt.u32.totalorder %s882_s9, %s878_s4  ;;  %p886_p8 = scmp.lt.u32.totalorder %s878_s4, %s1190_s8 }
 0x240   : > { %p880_p4 = pnand %p879_p0, %p1255_p12 }
 0x241   : > { %p885_p2 = por %p884_p7, %p883_p6 }
 0x242   : > { %p881_p13 = pneg %p880_p4 }
 0x243   : > { %p887_p1 = por %p886_p8, %p885_p2 }
 0x245   : > { %p888_p10 = pnand %p887_p1, %p881_p13 }
 0x247   : > { %891 = shalt.err (!%p888_p10)
}
 0x248   : > { %685 = dma.vmem_to_hbm [thread:$0]  (%p1255_p12), %s1185_s22, 128, %s1190_s8, %s470_s26   ;;  %v674_v28 = vpop.f32.mrb[3].mxu1 }
 0x249 PF: > { %s495_s28 = sand.u32 1, %s930_s12   ;;  %p1256_p3 = scmp.ne.s32.totalorder %s1248_s23, 0 }
 0x24a   : > { %p1257_p5 = scmp.ge.s32.totalorder %s950_s17, 2  ;;  %s496_s20 = scalar_lea.sflag [#allocation5], %s495_s28 }
 0x24c   : > { %p699_p9 = pnand %p1257_p5, %p1256_p3 }
 0x24e   : > { %925 = dma.done.wait (!%p699_p9), %s496_s20, 128  }
 0x24f   : > { %927 = vsyncadd (!%p699_p9), %s496_s20, 4294967168  ;;  %s20_s17 = sadd.s32 1, %s950_s17   ;;  %s1258_s12 = smov %s934_s13 }
 0x250   : > { %p17_p11 = scmp.ge.s32.totalorder %s20_s17, 4   ;;  %s1259_s13 = smov %s938_s14 }
 0x251   : > { %s1260_s14 = smov %s1122_s18  ;;  %s1261_s15 = smov %s946_s16 }
 0x252   : > { %s1262_s16 = smov %s1264_s19  ;;  %19 = sbr.rel (!%p17_p11) target bundleno = 7 (0x7), region = 95 }
 0x259   :  { %501 = vsyncpa [#allocation4], 1 }
 0x25a   :  { %503 = vsyncpa [#allocation4 + $0x1], 1 }
 0x25b   :  { %504 = vsyncpa [#allocation7], 1 }
 0x25c   :  { %505 = vsyncpa [#allocation5], 1 }
 0x25d   :  { %507 = vsyncpa [#allocation5 + $0x1], 1 }

</bundles_post_ra>
